<compile_context>
chip_gen: v7x
topology: tpu7x:2x2x1
jax: 0.10.0
libtpu: 0.0.40
codegen_flags: <defaults>
</compile_context>

<pallas_src>
from functools import partial

import jax
import jax.numpy as jnp
from jax.experimental import pallas as pl
from jax.experimental.pallas import tpu as pltpu


def qmix_kernel(q_ref, s_ref, wf_ref, bf_ref, exp_ref, w2b_ref, b2c_ref,
                out_ref, *, n_agents, qmix_hidden):
    N, Qh = n_agents, qmix_hidden
    NQ = N * Qh

    s = s_ref[...]                                   # (TM, S)   bf16
    q = q_ref[...]                                   # (TM, N)   f32

    # -- one fused hypernetwork matmul + lane-dense bias / activation epilogue
    z = jnp.dot(s, wf_ref[...], preferred_element_type=jnp.float32) + bf_ref[...]
    lane = jax.lax.broadcasted_iota(jnp.int32, (1, z.shape[-1]), 1)
    abs_sel = lane < NQ + Qh                                   # |W1|, |w2| lanes
    relu_sel = (lane >= NQ + 2 * Qh) & (lane < NQ + 3 * Qh)    # hyper_b2 hidden
    act = jnp.where(abs_sel, jnp.abs(z),
                    jnp.where(relu_sel, jnp.maximum(z, 0.0), z))

    w1 = act[:, :NQ]                                 # (TM, N*Qh)  |W1|
    w2 = act[:, NQ:NQ + Qh]                          # (TM, Qh)    |w2|
    b1 = act[:, NQ + Qh:NQ + 2 * Qh]                 # (TM, Qh)    b1
    h2 = act[:, NQ + 2 * Qh:NQ + 3 * Qh]             # (TM, Qh)    relu hidden

    # -- agent contraction: sum_a q[:, a] * w1[:, a*Qh:(a+1)*Qh] --------------
    # expand q to lane groups with an exact 0/1 matmul (MXU has slack)
    q_exp = jnp.dot(q, exp_ref[...], preferred_element_type=jnp.float32)  # (TM, NQ)
    p = q_exp * w1                                   # full-lane VPU multiply
    use_roll = (N > 1) and (N & (N - 1) == 0) and (NQ % 128 == 0)
    if use_roll:
        width = NQ
        while width > Qh:                            # log2(N) XLU rolls + adds
            p = p + pltpu.roll(p, shift=width // 2, axis=1)
            width //= 2
        agent_sum = p[:, :Qh]
    else:
        agent_sum = p[:, :Qh]
        for a in range(1, N):
            agent_sum = agent_sum + p[:, a * Qh:(a + 1) * Qh]

    # -- hidden = elu(q @ W1 + b1) --------------------------------------------
    hpre = agent_sum + b1
    hidden = jnp.where(hpre > 0.0, hpre, jnp.exp(jnp.minimum(hpre, 0.0)) - 1.0)

    # -- q_total = hidden . w2 + (h2 . Hb2b + c_b2b)  (single lane reduce) -----
    prod = hidden * w2 + h2 * w2b_ref[...]
    out_ref[...] = jnp.sum(prod, axis=-1, keepdims=True) + b2c_ref[...]


def _round_up(x, m):
    return ((x + m - 1) // m) * m


def qmix_forward(params, q_values, states):
    """q_values: (E, T, n_agents); states: (E, T, state_shape) -> (E, T, 1)."""
    E, T, N = q_values.shape
    S = states.shape[-1]
    Qh = params["hb1_w"].shape[-1]
    NQ = N * Qh
    ET = E * T

    # activations: q stays f32 (VPU only); states go bf16 (MXU operand)
    q2 = q_values.reshape(ET, N).astype(jnp.float32)
    s2 = states.reshape(ET, S).astype(jnp.bfloat16)

    # row tiling: big tiles (amortize per-step overhead), multiple of 16 for
    # bf16 sublane packing; keep >= 2 grid steps when there is enough work so
    # v7x's two TensorCores both get blocks.
    ET16 = _round_up(ET, 16)
    TM = min(2048, ET16)
    if TM == ET16 and ET16 >= 1024:
        TM = _round_up((ET16 + 1) // 2, 16)
    ET_pad = _round_up(ET16, TM)
    if ET_pad != ET:
        q2 = jnp.pad(q2, ((0, ET_pad - ET), (0, 0)))
        s2 = jnp.pad(s2, ((0, ET_pad - ET), (0, 0)))
    grid = (ET_pad // TM,)

    # fused hypernetwork weights: [Hw1 | Hw2 | Hb1 | Hb2a | zero pad] on lanes
    W = NQ + 3 * Qh
    Wpad = _round_up(W, 128)
    wf = jnp.concatenate(
        [params["hw1_w"], params["hw2_w"], params["hb1_w"], params["hb2_w1"]],
        axis=1).astype(jnp.float32)
    bf = jnp.concatenate(
        [params["hw1_b"], params["hw2_b"], params["hb1_b"], params["hb2_b1"]],
        axis=1).astype(jnp.float32)
    if Wpad != W:
        wf = jnp.pad(wf, ((0, 0), (0, Wpad - W)))
        bf = jnp.pad(bf, ((0, 0), (0, Wpad - W)))
    wf = wf.astype(jnp.bfloat16)                    # (S, Wpad) bf16
    bf = bf.astype(jnp.float32)                     # (1, Wpad) f32

    # agent -> lane-group expansion matrix (exact 0/1 entries, f32)
    expand = jnp.repeat(jnp.eye(N, dtype=jnp.float32), Qh, axis=1)   # (N, NQ)
    w2b = params["hb2_w2"].T.astype(jnp.float32)    # (1, Qh)
    b2c = params["hb2_b2"].astype(jnp.float32)      # (1, 1)

    in_specs = [
        pl.BlockSpec((TM, N), lambda i: (i, 0)),        # q rows
        pl.BlockSpec((TM, S), lambda i: (i, 0)),        # state rows
        pl.BlockSpec((S, Wpad), lambda i: (0, 0)),      # fused hypernet weights
        pl.BlockSpec((1, Wpad), lambda i: (0, 0)),      # fused hypernet biases
        pl.BlockSpec((N, NQ), lambda i: (0, 0)),        # agent expansion
        pl.BlockSpec((1, Qh), lambda i: (0, 0)),        # hyper_b2 second layer w
        pl.BlockSpec((1, 1), lambda i: (0, 0)),         # hyper_b2 second layer b
    ]

    out = pl.pallas_call(
        partial(qmix_kernel, n_agents=N, qmix_hidden=Qh),
        grid=grid,
        in_specs=in_specs,
        out_specs=pl.BlockSpec((TM, 1), lambda i: (i, 0)),
        out_shape=jax.ShapeDtypeStruct((ET_pad, 1), jnp.float32),
        compiler_params=pltpu.CompilerParams(
            dimension_semantics=("parallel",)),
    )(q2, s2, wf, bf, expand, w2b, b2c)

    return out[:ET].reshape(E, T, 1)


def init_params(key, state_shape, n_agents, qmix_hidden_dim):
    """Matches torch nn.Linear default init; weights stored (din, dout)."""
    def lin(k, din, dout):
        kw, kb = jax.random.split(k)
        bound = 1.0 / jnp.sqrt(jnp.float32(din))
        w = jax.random.uniform(kw, (din, dout), jnp.float32, -bound, bound)
        b = jax.random.uniform(kb, (1, dout), jnp.float32, -bound, bound)
        return w, b

    ks = jax.random.split(key, 5)
    hw1_w, hw1_b = lin(ks[0], state_shape, n_agents * qmix_hidden_dim)  # hyper_w1
    hw2_w, hw2_b = lin(ks[1], state_shape, qmix_hidden_dim)             # hyper_w2
    hb1_w, hb1_b = lin(ks[2], state_shape, qmix_hidden_dim)             # hyper_b1
    hb2_w1, hb2_b1 = lin(ks[3], state_shape, qmix_hidden_dim)           # hyper_b2[0]
    hb2_w2, hb2_b2 = lin(ks[4], qmix_hidden_dim, 1)                     # hyper_b2[2]
    return {
        "hw1_w": hw1_w, "hw1_b": hw1_b,
        "hw2_w": hw2_w, "hw2_b": hw2_b,
        "hb1_w": hb1_w, "hb1_b": hb1_b,
        "hb2_w1": hb2_w1, "hb2_b1": hb2_b1,
        "hb2_w2": hb2_w2, "hb2_b2": hb2_b2,
    }


def qmix_reference(params, q_values, states):
    """Pure-JAX mirror of the PyTorch QMixNet.forward (f32 semantics)."""
    E, T, N = q_values.shape
    S = states.shape[-1]
    Qh = params["hb1_w"].shape[-1]
    q = q_values.reshape(-1, 1, N).astype(jnp.float32)
    s = states.reshape(-1, S).astype(jnp.float32)

    w1 = jnp.abs(s @ params["hw1_w"] + params["hw1_b"]).reshape(-1, N, Qh)
    b1 = (s @ params["hb1_w"] + params["hb1_b"]).reshape(-1, 1, Qh)
    hpre = jnp.matmul(q, w1) + b1
    hidden = jnp.where(hpre > 0.0, hpre, jnp.exp(jnp.minimum(hpre, 0.0)) - 1.0)

    w2 = jnp.abs(s @ params["hw2_w"] + params["hw2_b"]).reshape(-1, Qh, 1)
    b2h = jnp.maximum(s @ params["hb2_w1"] + params["hb2_b1"], 0.0)
    b2 = (b2h @ params["hb2_w2"] + params["hb2_b2"]).reshape(-1, 1, 1)

    q_total = jnp.matmul(hidden, w2) + b2
    return q_total.reshape(E, -1, 1)


def _quantize_like_kernel(params):
    """Round the matmul-operand weights through bf16 (what the kernel consumes)."""
    def q(x):
        return x.astype(jnp.bfloat16).astype(jnp.float32)
    out = dict(params)
    for k in ("hw1_w", "hw2_w", "hb1_w", "hb2_w1"):
        out[k] = q(params[k])
    return out


if __name__ == "__main__":
    # small args: episode_num=2, max_episode_len=8, n_agents=4,
    # state_shape=24, qmix_hidden_dim=32
    E, T, N = 2, 8, 4
    state_shape, qmix_hidden_dim = 24, 32

    key = jax.random.PRNGKey(0)
    kp, kq, ks = jax.random.split(key, 3)
    params = init_params(kp, state_shape, N, qmix_hidden_dim)
    q_values = jax.random.normal(kq, (E, T, N), jnp.float32)
    states = jax.random.normal(ks, (E, T, state_shape), jnp.float32)

    q_total = qmix_forward(params, q_values, states)
    q_total = jax.block_until_ready(q_total)
    assert q_total.shape == (E, T, 1)

    # strict check: reference evaluated on the exact bf16-rounded operands the
    # kernel sees (bf16 x bf16 products are exact in f32, so this is tight).
    params_q = _quantize_like_kernel(params)
    states_q = states.astype(jnp.bfloat16).astype(jnp.float32)
    ref_strict = qmix_reference(params_q, q_values, states_q)
    assert jnp.allclose(q_total, ref_strict, atol=5e-3, rtol=5e-3)

    # loose sanity vs full-f32 semantics (bf16 input-quantization error only).
    ref_f32 = qmix_reference(params, q_values, states)
    assert float(jnp.max(jnp.abs(q_total - ref_f32))) < 0.5

    print("KERNEL_OK")
</pallas_src>

<mosaic_0001>
module attributes {stable_mosaic.version = 11 : i64} {
  func.func @qmix_kernel(%arg0: i32, %arg1: memref<16x4xf32, #tpu.memory_space<vmem>>, %arg2: memref<16x24xbf16, #tpu.memory_space<vmem>>, %arg3: memref<24x256xbf16, #tpu.memory_space<vmem>>, %arg4: memref<1x256xf32, #tpu.memory_space<vmem>>, %arg5: memref<4x128xf32, #tpu.memory_space<vmem>>, %arg6: memref<1x32xf32, #tpu.memory_space<vmem>>, %arg7: memref<1x1xf32, #tpu.memory_space<vmem>>, %arg8: memref<16x1xf32, #tpu.memory_space<vmem>>) attributes {dimension_semantics = [#tpu.dimension_semantics<parallel>], iteration_bounds = array<i64: 1>, scalar_prefetch = 0 : i64, scratch_operands = 0 : i64, tpu.core_type = #tpu.core_type<tc>, window_params = [{transform_indices = @transform_0, window_bounds = array<i64: 16, 4>}, {transform_indices = @transform_1, window_bounds = array<i64: 16, 24>}, {pipeline_mode = #tpu.pipeline_mode<synchronous>, transform_indices = @transform_2, window_bounds = array<i64: 24, 256>}, {pipeline_mode = #tpu.pipeline_mode<synchronous>, transform_indices = @transform_3, window_bounds = array<i64: 1, 256>}, {pipeline_mode = #tpu.pipeline_mode<synchronous>, transform_indices = @transform_4, window_bounds = array<i64: 4, 128>}, {pipeline_mode = #tpu.pipeline_mode<synchronous>, transform_indices = @transform_5, window_bounds = array<i64: 1, 32>}, {pipeline_mode = #tpu.pipeline_mode<synchronous>, transform_indices = @transform_6, window_bounds = array<i64: 1, 1>}, {transform_indices = @transform_7, window_bounds = array<i64: 16, 1>}]} {
    %c0 = arith.constant 0 : index
    %c0_0 = arith.constant 0 : index
    %0 = vector.load %arg2[%c0, %c0_0] : memref<16x24xbf16, #tpu.memory_space<vmem>>, vector<16x24xbf16>
    %c0_1 = arith.constant 0 : index
    %c0_2 = arith.constant 0 : index
    %1 = vector.load %arg1[%c0_1, %c0_2] : memref<16x4xf32, #tpu.memory_space<vmem>>, vector<16x4xf32>
    %c0_3 = arith.constant 0 : index
    %c0_4 = arith.constant 0 : index
    %2 = vector.load %arg3[%c0_3, %c0_4] : memref<24x256xbf16, #tpu.memory_space<vmem>>, vector<24x256xbf16>
    %cst = arith.constant dense<0.000000e+00> : vector<16x256xf32>
    %3 = tpu.matmul %0, %2, %cst {dimension_numbers = #tpu.dot_dimension_numbers<[1], [0], [0], [1], [0, 0, 1, 1], [], []>} : vector<16x24xbf16>, vector<24x256xbf16>, vector<16x256xf32> -> vector<16x256xf32>
    %c0_5 = arith.constant 0 : index
    %c0_6 = arith.constant 0 : index
    %4 = vector.load %arg4[%c0_5, %c0_6] : memref<1x256xf32, #tpu.memory_space<vmem>>, vector<1x256xf32>
    %5 = vector.broadcast %4 : vector<1x256xf32> to vector<16x256xf32>
    %6 = arith.addf %3, %5 : vector<16x256xf32>
    %7 = tpu.iota {dimensions = array<i32: 1>} : vector<1x256xi32>
    %c160_i32 = arith.constant 160 : i32
    %8 = vector.broadcast %c160_i32 : i32 to vector<1x256xi32>
    %9 = arith.cmpi slt, %7, %8 : vector<1x256xi32>
    %c192_i32 = arith.constant 192 : i32
    %10 = vector.broadcast %c192_i32 : i32 to vector<1x256xi32>
    %11 = arith.cmpi sge, %7, %10 : vector<1x256xi32>
    %c224_i32 = arith.constant 224 : i32
    %12 = vector.broadcast %c224_i32 : i32 to vector<1x256xi32>
    %13 = arith.cmpi slt, %7, %12 : vector<1x256xi32>
    %14 = arith.andi %11, %13 : vector<1x256xi1>
    %15 = math.absf %6 : vector<16x256xf32>
    %cst_7 = arith.constant 0.000000e+00 : f32
    %16 = vector.broadcast %cst_7 : f32 to vector<16x256xf32>
    %17 = arith.maximumf %6, %16 : vector<16x256xf32>
    %18 = vector.shape_cast %14 : vector<1x256xi1> to vector<1x256xi1>
    %19 = vector.broadcast %18 : vector<1x256xi1> to vector<16x256xi1>
    %20 = arith.select %19, %17, %6 : vector<16x256xi1>, vector<16x256xf32>
    %21 = vector.shape_cast %9 : vector<1x256xi1> to vector<1x256xi1>
    %22 = vector.broadcast %21 : vector<1x256xi1> to vector<16x256xi1>
    %23 = arith.select %22, %15, %20 : vector<16x256xi1>, vector<16x256xf32>
    %24 = vector.extract_strided_slice %23 {offsets = [0, 0], sizes = [16, 128], strides = [1, 1]} : vector<16x256xf32> to vector<16x128xf32>
    %25 = vector.extract_strided_slice %23 {offsets = [0, 128], sizes = [16, 32], strides = [1, 1]} : vector<16x256xf32> to vector<16x32xf32>
    %26 = vector.extract_strided_slice %23 {offsets = [0, 160], sizes = [16, 32], strides = [1, 1]} : vector<16x256xf32> to vector<16x32xf32>
    %27 = vector.extract_strided_slice %23 {offsets = [0, 192], sizes = [16, 32], strides = [1, 1]} : vector<16x256xf32> to vector<16x32xf32>
    %c0_8 = arith.constant 0 : index
    %c0_9 = arith.constant 0 : index
    %28 = vector.load %arg5[%c0_8, %c0_9] : memref<4x128xf32, #tpu.memory_space<vmem>>, vector<4x128xf32>
    %cst_10 = arith.constant dense<0.000000e+00> : vector<16x128xf32>
    %29 = tpu.matmul %1, %28, %cst_10 {dimension_numbers = #tpu.dot_dimension_numbers<[1], [0], [0], [1], [0, 0, 1, 1], [], []>} : vector<16x4xf32>, vector<4x128xf32>, vector<16x128xf32> -> vector<16x128xf32>
    %30 = arith.mulf %29, %24 : vector<16x128xf32>
    %c64_i32 = arith.constant 64 : i32
    %31 = tpu.dynamic_rotate %30 by %c64_i32 dim 1 : vector<16x128xf32>, i32 -> vector<16x128xf32>
    %32 = arith.addf %30, %31 : vector<16x128xf32>
    %c32_i32 = arith.constant 32 : i32
    %33 = tpu.dynamic_rotate %32 by %c32_i32 dim 1 : vector<16x128xf32>, i32 -> vector<16x128xf32>
    %34 = arith.addf %32, %33 : vector<16x128xf32>
    %35 = vector.extract_strided_slice %34 {offsets = [0, 0], sizes = [16, 32], strides = [1, 1]} : vector<16x128xf32> to vector<16x32xf32>
    %36 = arith.addf %35, %26 : vector<16x32xf32>
    %cst_11 = arith.constant 0.000000e+00 : f32
    %37 = vector.broadcast %cst_11 : f32 to vector<16x32xf32>
    %38 = arith.cmpf ogt, %36, %37 : vector<16x32xf32>
    %cst_12 = arith.constant 0.000000e+00 : f32
    %39 = vector.broadcast %cst_12 : f32 to vector<16x32xf32>
    %40 = arith.minimumf %36, %39 : vector<16x32xf32>
    %41 = math.exp %40 : vector<16x32xf32>
    %cst_13 = arith.constant 1.000000e+00 : f32
    %42 = vector.broadcast %cst_13 : f32 to vector<16x32xf32>
    %43 = arith.subf %41, %42 : vector<16x32xf32>
    %44 = arith.select %38, %36, %43 : vector<16x32xi1>, vector<16x32xf32>
    %45 = arith.mulf %44, %25 : vector<16x32xf32>
    %c0_14 = arith.constant 0 : index
    %c0_15 = arith.constant 0 : index
    %46 = vector.load %arg6[%c0_14, %c0_15] : memref<1x32xf32, #tpu.memory_space<vmem>>, vector<1x32xf32>
    %47 = vector.broadcast %46 : vector<1x32xf32> to vector<16x32xf32>
    %48 = arith.mulf %27, %47 : vector<16x32xf32>
    %49 = arith.addf %45, %48 : vector<16x32xf32>
    %cst_16 = arith.constant dense<0.000000e+00> : vector<16xf32>
    %50 = vector.multi_reduction <add>, %49, %cst_16 [1] : vector<16x32xf32> to vector<16xf32>
    %51 = vector.shape_cast %50 : vector<16xf32> to vector<16x1xf32>
    %c0_17 = arith.constant 0 : index
    %c0_18 = arith.constant 0 : index
    %52 = vector.load %arg7[%c0_17, %c0_18] : memref<1x1xf32, #tpu.memory_space<vmem>>, vector<1x1xf32>
    %53 = vector.broadcast %52 : vector<1x1xf32> to vector<16x1xf32>
    %54 = arith.addf %51, %53 : vector<16x1xf32>
    %c0_19 = arith.constant 0 : index
    %c0_20 = arith.constant 0 : index
    %55 = vector.load %arg8[%c0_19, %c0_20] : memref<16x1xf32, #tpu.memory_space<vmem>>, vector<16x1xf32>
    tpu.vector_store %arg8[%c0_19, %c0_20], %54 {strides = array<i32>} : memref<16x1xf32, #tpu.memory_space<vmem>>, vector<16x1xf32>,
    return
  }
  func.func @transform_0(%arg0: i32) -> (i32, i32) {
    %c0_i32 = arith.constant 0 : i32
    %c0_i32_0 = arith.constant 0 : i32
    return %arg0, %c0_i32 : i32, i32
  }
  func.func @transform_1(%arg0: i32) -> (i32, i32) {
    %c0_i32 = arith.constant 0 : i32
    %c0_i32_0 = arith.constant 0 : i32
    return %arg0, %c0_i32 : i32, i32
  }
  func.func @transform_2(%arg0: i32) -> (i32, i32) {
    %c0_i32 = arith.constant 0 : i32
    %c0_i32_0 = arith.constant 0 : i32
    %c0_i32_1 = arith.constant 0 : i32
    return %c0_i32, %c0_i32_0 : i32, i32
  }
  func.func @transform_3(%arg0: i32) -> (i32, i32) {
    %c0_i32 = arith.constant 0 : i32
    %c0_i32_0 = arith.constant 0 : i32
    %c0_i32_1 = arith.constant 0 : i32
    return %c0_i32, %c0_i32_0 : i32, i32
  }
  func.func @transform_4(%arg0: i32) -> (i32, i32) {
    %c0_i32 = arith.constant 0 : i32
    %c0_i32_0 = arith.constant 0 : i32
    %c0_i32_1 = arith.constant 0 : i32
    return %c0_i32, %c0_i32_0 : i32, i32
  }
  func.func @transform_5(%arg0: i32) -> (i32, i32) {
    %c0_i32 = arith.constant 0 : i32
    %c0_i32_0 = arith.constant 0 : i32
    %c0_i32_1 = arith.constant 0 : i32
    return %c0_i32, %c0_i32_0 : i32, i32
  }
  func.func @transform_6(%arg0: i32) -> (i32, i32) {
    %c0_i32 = arith.constant 0 : i32
    %c0_i32_0 = arith.constant 0 : i32
    %c0_i32_1 = arith.constant 0 : i32
    return %c0_i32, %c0_i32_0 : i32, i32
  }
  func.func @transform_7(%arg0: i32) -> (i32, i32) {
    %c0_i32 = arith.constant 0 : i32
    %c0_i32_0 = arith.constant 0 : i32
    return %arg0, %c0_i32 : i32, i32
  }
}

</mosaic_0001>

<bundles_post_ra>
// kernel: tpu_custom_call.1
= control target key start
LH: loop header
LB: loop body
LE: loop exit
PB: predicated region body
PF: predicated region fallthrough
CT: control target
= control target key end

     0   :  { %s508_s0 = inlined_call_operand.vmem [shape: f32[16,4], index: 0, kind: input, shape index: {}]   ;;  %s509_s1 = inlined_call_operand.hbm [shape: bf16[16,24], index: 1, kind: input, shape index: {}]   ;;  %s510_s2 = inlined_call_operand.vmem [shape: bf16[24,256], index: 2, kind: input, shape index: {}]   ;;  %s511_s3 = inlined_call_operand.vmem [shape: f32[1,256], index: 3, kind: input, shape index: {}]   ;;  %s512_s4 = inlined_call_operand.vmem [shape: f32[4,128], index: 4, kind: input, shape index: {}]   ;;  %s513_s5 = inlined_call_operand.vmem [shape: f32[1,32], index: 5, kind: input, shape index: {}]   ;;  %s514_s6 = inlined_call_operand.<no memory space> [shape: f32[1,1], index: 6, kind: input, shape index: {}]   ;;  %s515_s7 = inlined_call_operand.vmem [shape: f32[16,1], index: 7, kind: output, shape index: {}]  }
   0x1   :  { %v12_v0 = vstv %s514_s6 }
   0x2   :  { %13 = vst [vmem:[#allocation2] sm:$0x1] %v12_v0 }
   0x3   :  { %14 = vsyncpa [#allocation4], 0  ;;  %s402_s26 = smov [#allocation3]   ;;  %s378_s30 = scalar_lea.hbm %s509_s1, 128 }
   0x4   :  { %s22_s27 = sshll.u32 %s402_s26, 4  ;;  %p379_p0 = scmp.ne.s32.totalorder %s509_s1, %s378_s30  ;;  %s23_s27 = int_to_ptr.vmem [resolvable:$true] %s22_s27 }
   0x5   :  { %p382_p1 = scmp.lt.u32.totalorder %s378_s30, %s509_s1 }
   0x7   :  { %p384_p2 = pnand %p382_p1, %p379_p0 }
   0x9   :  { %387 = shalt.err (!%p384_p2)
}
   0xa   :  { %s388_s6 = scalar_lea.vmem %s23_s27, 128  ;;  %p393_p4 = scmp.lt.s32.totalorder %s23_s27, %s23_s27 }
   0xb   :  { %p389_p3 = scmp.ne.s32.totalorder %s23_s27, %s388_s6  ;;  %p394_p5 = scmp.lt.s32.totalorder %s388_s6, %s388_s6 }
   0xd   :  { %p395_p6 = por %p394_p5, %p393_p4 }
   0xf   :  { %p396_p7 = pnand %p395_p6, %p389_p3 }
  0x11   :  { %399 = shalt.err (!%p396_p7)
}
  0x12   :  { %s403_s12 = smov 64   ;;  %s404_s13 = smov 4  }
  0x13   :  { %28 = dma.hbm_to_vmem [thread:$0]  %s509_s1, 128, %s23_s27, [#allocation4], %s403_s12, %s403_s12, %s404_s13  }
  0x14   :  { %400 = dma.done.wait [#allocation4], 128  }
  0x15   :  { %401 = vsyncadd [#allocation4], 4294967168  ;;  %v405_v1 = vmov 0   ;;  %v368_v2 = vld [vmem:[%s510_s2 + $0x4] ss:$8 sps:$4 sm:$0xff]   ;;  %v49_v4 = vld [vmem:[%s510_s2 + $0x10] sm:$0xff]  ;;  %v52_v13 = vlaneseq }
  0x16   :  { %125 = vmatprep.mubr.bf16.mxu0 %v405_v1  ;;  %v370_v3 = vld [vmem:[%s510_s2] ss:$8 sps:$4 sm:$0xff]   ;;  %vm86_vm0 = vcmask 1043456   ;;  %93 = vmatprep.subr.bf16.mxu0 %v368_v2  ;;  %v344_v5 = vcombine.high %v49_v4, %v49_v4  ;;  %v343_v6 = vcombine.low %v49_v4, %v49_v4  ;;  %vm172_vm1 = vcmask 31744  }
  0x17   :  { %v171_v7 = vld [vmem:[%s512_s4] sm:$0xf]  ;;  %94 = vmatpush1.bf16.msra.mxu0 %v370_v3  ;;  %v46_v9 = vld [vmem:[%s508_s0 + $0x8] sm:$0xff]  ;;  %vm82_vm2 = vcmask 195584   ;;  %v53_v14 = vshrl.u32 %v52_v13, 7  ;;  %v137_v31 = vand.u32 127, %v52_v13 }
  0x18   :  { %357 = vmatprep.subr.msk.mxu1 %vm86_vm0, %v171_v7  ;;  %v45_v8 = vld [vmem:[%s508_s0] sm:$0xff]  ;;  %345 = vmatprep.subr.msk.bf16.mxu0 %vm86_vm0, %v344_v5  ;;  %v88_v11 = vsel %vm86_vm0, %v343_v6, 0  ;;  %vm316_vm8 = vcmask 261120   ;;  %vm332_vm10 = vcmask 7168  }
  0x19   :  { %v352_v10 = vld [vmem:[%s513_s5] ss:$0 sm:$0xff]  ;;  %358 = vmatpush3.msk.msra.mxu1 %vm86_vm0, %v171_v7  ;;  %359 = vmatprep.mubr.msk.f32.mxu1 %vm172_vm1, %v45_v8  ;;  %v373_v12 = vld [vmem:[#allocation3] sm:$0xff]   ;;  %v54_v15 = vsub.s32 0, %v53_v14  ;;  %v58_v30 = vsub.s32 1, %v53_v14  ;;  %v138_v33 = vadd.s32 128, %v137_v31 }
  0x1a   :  { %301 = vrot.lane.b32.xlu1 %v352_v10, %s403_s12  ;;  %360 = vmatmul.mubr.msk.f32.vlgmr.msra.gmra.mrb[0].mxu1 %vm172_vm1, %v46_v9  ;;  %v50_v16 = vld [vmem:[%s511_s3] sm:$0x3]  ;;  %s406_s3 = smov 32   ;;  %s407_s5 = smov 96  }
  0x1b   :  { %96 = vmatpush1.bf16.msra.mxu0 %v88_v11  ;;  %v55_v18 = vrot.slane %v50_v16, %v54_v15  ;;  %v59_v32 = vrot.slane %v50_v16, %v58_v30  ;;  %vm142_vm3 = vcmp.ge.s32.totalorder %v138_v33, 192  ;;  %vm144_vm4 = vcmp.lt.s32.totalorder %v138_v33, 224  ;;  %v353_v14 = vld [vmem:[#allocation2] ss:$0 sm:$0xff] }
  0x1c   :  { %vm492_vm5 = vmand %vm142_vm3, %vm144_vm4  ;;  %vm140_vm6 = vcmp.lt.s32.totalorder %v138_v33, 160 }
  0x1e   :  { %346 = vmatmul.mubr.msk.bf16.vlgmr.msra.gmra.mrb[0].mxu0 %vm82_vm2, %v373_v12 }
  0x8c   :  { %v302_v46 = vpop.permute.xlu1 %301 }
  0xed   :  { %v361_v17 = vpop.f32.mrb[0].mxu1 }
  0xee   :  { %v248_v19 = vpop.f32.mrb[1].mxu1 }
  0xf1   :  { %v127_v20 = vpop.f32.mrb[0].mxu0 }
  0xf2   :  { %v128_v21 = vadd.f32 %v127_v20, %v55_v18  ;;  %v129_v22 = vpop.f32.mrb[1].mxu0 }
  0xf3   :  { %v131_v23 = vpop.f32.mrb[2].mxu0  ;;  %v130_v34 = vadd.f32 %v129_v22, %v59_v32 }
  0xf4   :  { %v147_v24 = vand.u32 2147483647, %v128_v21  ;;  %v132_v25 = vadd.f32 %v131_v23, %v55_v18  ;;  %v133_v26 = vpop.f32.mrb[3].mxu0 }
  0xf5   :  { %v152_v35 = vmax.f32 %v130_v34, 0.0  ;;  %v134_v36 = vadd.f32 %v133_v26, %v59_v32  ;;  %v148_v40 = vand.u32 2147483647, %v130_v34 }
  0xf6   :  { %v149_v27 = vand.u32 2147483647, %v132_v25  ;;  %v257_v28 = vmul.f32 %v248_v19, %v147_v24 }
  0xf7   :  { %v154_v41 = vmax.f32 %v134_v36, 0.0  ;;  %v160_v42 = vsel %vm492_vm5, %v152_v35, %v130_v34  ;;  %v150_v45 = vand.u32 2147483647, %v134_v36 }
  0xf8   :  { %v258_v29 = vmul.f32 %v361_v17, %v149_v27  ;;  %259 = vrot.lane.b32.xlu0 %v257_v28, %s403_s12  ;;  %v168_v47 = vsel %vm140_vm6, %v148_v40, %v160_v42 }
  0xf9   :  { %v162_v48 = vsel %vm492_vm5, %v154_v41, %v134_v36  ;;  %v304_v49 = vmul.f32 %v302_v46, %v168_v47 }
  0xfa   :  { %v170_v50 = vsel %vm140_vm6, %v150_v45, %v162_v48 }
  0xfb   :  { %v305_v51 = vmul.f32 %v302_v46, %v170_v50 }
  0xfc   :  { %261 = vrot.lane.b32.xlu0 %v258_v29, %s403_s12 }
 0x16a   :  { %v260_v37 = vpop.permute.xlu0 %259 }
 0x16b   :  { %v263_v39 = vadd.f32 %v260_v37, %v257_v28 }
 0x16d   :  { %265 = vrot.lane.b32.xlu1 %v263_v39, %s406_s3 }
 0x16e   :  { %v262_v43 = vpop.permute.xlu0 %261 }
 0x16f   :  { %v264_v44 = vadd.f32 %v262_v43, %v258_v29 }
 0x171   :  { %273 = vrot.lane.b32.xlu1 %v168_v47, %s407_s5  ;;  %267 = vrot.lane.b32.xlu0 %v264_v44, %s406_s3 }
 0x175   :  { %308 = vrot.lane.b32.xlu1 %v304_v49, %s403_s12  ;;  %275 = vrot.lane.b32.xlu0 %v170_v50, %s407_s5 }
 0x179   :  { %310 = vrot.lane.b32.xlu0 %v305_v51, %s403_s12 }
 0x1df   :  { %v266_v52 = vpop.permute.xlu1 %265 }
 0x1e0   :  { %v269_v53 = vadd.f32 %v266_v52, %v263_v39 }
 0x1e3   :  { %v274_v54 = vpop.permute.xlu1 %273  ;;  %v268_v55 = vpop.permute.xlu0 %267 }
 0x1e4   :  { %v279_v56 = vadd.f32 %v274_v54, %v269_v53  ;;  %v270_v58 = vadd.f32 %v268_v55, %v264_v44 }
 0x1e6   :  { %v283_v57 = vmin.f32 %v279_v56, 0.0  ;;  %vm281_vm7 = vcmp.gt.f32.partialorder %v279_v56, 0.0 }
 0x1e7   :  { %v276_v59 = vpop.permute.xlu0 %275  ;;  %v309_v5 = vpop.permute.xlu1 %308 }
 0x1e8   :  { %v285_v60 = vmul.f32 1.442695, %v283_v57  ;;  %v280_v61 = vadd.f32 %v276_v59, %v270_v58 }
 0x1ea   :  { %374 = vpow2.f32 %v285_v60  ;;  %v284_v62 = vmin.f32 %v280_v61, 0.0  ;;  %vm282_vm9 = vcmp.gt.f32.partialorder %v280_v61, 0.0 }
 0x1eb   :  { %v311_v11 = vpop.permute.xlu0 %310 }
 0x1ec   :  { %v287_v63 = vmul.f32 1.442695, %v284_v62 }
 0x1ee   :  { %376 = vpow2.f32 %v287_v63 }
 0x1f4   :  { %v375_v0 = vpop.eup %374 }
 0x1f5   :  { %v350_v1 = vadd.f32 -1.0, %v375_v0 }
 0x1f7   :  { %v291_v2 = vsel %vm281_vm7, %v279_v56, %v350_v1 }
 0x1f8   :  { %v377_v3 = vpop.eup %376  ;;  %v293_v4 = vmul.f32 %v291_v2, %v168_v47 }
 0x1f9   :  { %v351_v6 = vadd.f32 -1.0, %v377_v3 }
 0x1fa   :  { %v314_v7 = vadd.f32 %v309_v5, %v293_v4 }
 0x1fb   :  { %v292_v8 = vsel %vm282_vm9, %v280_v61, %v351_v6 }
 0x1fc   :  { %v294_v9 = vmul.f32 %v292_v8, %v170_v50  ;;  %v317_v10 = vsel %vm316_vm8, %v314_v7, 0.0 }
 0x1fd   :  { %318 = vadd.xlane.f32.xlu1 %v317_v10 }
 0x1fe   :  { %v315_v12 = vadd.f32 %v311_v11, %v294_v9 }
 0x200   :  { %v320_v13 = vsel %vm316_vm8, %v315_v12, 0.0 }
 0x201   :  { %321 = vadd.xlane.f32.xlu0 %v320_v13 }
 0x28a   :  { %v319_v15 = vpop.xlane.xlu1 %318 }
 0x28b   :  { %v330_v16 = vadd.f32 %v353_v14, %v319_v15 }
 0x28d   :  { %333 = vst.msk [vmem:[%s515_s7] sm:$0xff] %vm332_vm10, %v330_v16 }
 0x28e   :  { %v322_v17 = vpop.xlane.xlu0 %321 }
 0x28f   :  { %v331_v18 = vadd.f32 %v353_v14, %v322_v17 }
 0x291   :  { %334 = vst.msk [vmem:[%s515_s7 + $0x8] sm:$0xff] %vm332_vm10, %v331_v18 }
 0x292   :  { %339 = vsyncpa [#allocation4], 1 }

</bundles_post_ra>
